<compile_context>
chip_gen: v5e
topology: v5e:2x2
jax: 0.10.0
libtpu: 0.0.40
codegen_flags: <defaults>
</compile_context>

<pallas_src>
import jax
import jax.numpy as jnp
from jax import lax
from jax.experimental import pallas as pl
from jax.experimental.pallas import tpu as pltpu


def _round_up(x, m):
    return ((x + m - 1) // m) * m


def _pool(x):
    """[N, C, H, W] -> adaptive_avg_pool2d(1) -> [N, C];  [N, C] passes through."""
    if x.ndim == 4:
        n, c, h, w = x.shape
        return jnp.mean(x.reshape(n, c, h * w), axis=2)
    assert x.ndim == 2
    return x


def _l2_normalize(x, eps=1e-12):
    ss = jnp.sum(x * x, axis=1, keepdims=True)
    return x * lax.rsqrt(jnp.maximum(ss, eps * eps))


# -----------------------------------------------------------------------------
# Fused kernel: L2-normalize query tile, cosine sim, top-(k+1), proto scores.
# -----------------------------------------------------------------------------
def _make_kernel(kp1, n_support, half, matmul_dtype):
    def kernel(q_ref, st_ref, oh_ref, dk_ref, sc_ref):
        # ---- L2-normalize pooled query rows (f32 VPU math, EUP rsqrt) -----------
        q = q_ref[...].astype(jnp.float32)                         # [tq, C]
        q_ss = jnp.sum(q * q, axis=1, keepdims=True)               # [tq, 1]
        qn = q * lax.rsqrt(jnp.maximum(q_ss, 1e-24))               # eps = 1e-12 ^ 2

        # ---- cosine similarity against precomputed normalized support (MXU) -----
        sim = lax.dot_general(qn.astype(matmul_dtype), st_ref[...],
                              (((1,), (0,)), ((), ())),
                              preferred_element_type=jnp.float32)   # [tq, Ns]

        # ---- prototypical scores reuse sim; rsqrt(||proto||) is folded into oh --
        sc_ref[...] = lax.dot_general(sim, oh_ref[...],
                                      (((1,), (0,)), ((), ())),
                                      preferred_element_type=jnp.float32)  # [tq, WPAD]

        # ---- iterative top-(k+1) smallest cosine distances ----------------------
        # distances go to lanes [0, kp1), indices (as exact f32) to lanes
        # [half, half + kp1) of ONE lane-dense 128-padded output (single vst).
        d = 1.0 - sim
        col_ids = lax.broadcasted_iota(jnp.int32, d.shape, 1)       # [tq, Ns]
        out_col = lax.broadcasted_iota(jnp.int32, dk_ref.shape, 1)  # [tq, PK]
        packed = jnp.zeros(dk_ref.shape, jnp.float32)
        for j in range(kp1):                                        # tiny, static
            mv = jnp.min(d, axis=1, keepdims=True)                  # [tq, 1]
            idx = jnp.min(jnp.where(d == mv, col_ids, n_support),
                          axis=1, keepdims=True)                    # [tq, 1]
            packed = jnp.where(out_col == j, mv, packed)
            packed = jnp.where(out_col == half + j, idx.astype(jnp.float32), packed)
            d = jnp.where(col_ids == idx, jnp.float32(jnp.inf), d)
        dk_ref[...] = packed

    return kernel


def _fused_call(q_pad, s_nt, oh_scaled, kp1, tq, pk):
    nq_pad, c = q_pad.shape
    _, ns = s_nt.shape
    wpad = oh_scaled.shape[1]
    half = pk // 2
    grid = (nq_pad // tq,)

    dk, sc = pl.pallas_call(
        _make_kernel(kp1, ns, half, s_nt.dtype),
        out_shape=(jax.ShapeDtypeStruct((nq_pad, pk), jnp.float32),
                   jax.ShapeDtypeStruct((nq_pad, wpad), jnp.float32)),
        grid=grid,
        in_specs=[
            pl.BlockSpec((tq, c), lambda i: (i, 0)),      # lane-dense query tile
            pl.BlockSpec((c, ns), lambda i: (0, 0)),      # normalized support (resident)
            pl.BlockSpec((ns, wpad), lambda i: (0, 0)),   # pre-scaled one-hot (resident)
        ],
        out_specs=(
            pl.BlockSpec((tq, pk), lambda i: (i, 0)),     # packed dist|idx
            pl.BlockSpec((tq, wpad), lambda i: (i, 0)),   # class scores
        ),
        compiler_params=pltpu.CompilerParams(
            dimension_semantics=("parallel",),            # v7x: tiles split over 2 TCs
            vmem_limit_bytes=48 * 1024 * 1024,            # < v7x 64 MiB, > v5e/v6e defaults
        ),
    )(q_pad, s_nt, oh_scaled)
    return dk, sc


# -----------------------------------------------------------------------------
# Wrapper reproducing PN_head.forward
# -----------------------------------------------------------------------------
def pn_head_forward(scale_cls, proto_support_images, proto_support_labels,
                    query_images, support_images, support_labels, k,
                    num_classes=None, block_q=512, matmul_dtype=jnp.float32):
    # support_images / support_labels are accepted but unused, as in the reference.
    del support_images, support_labels

    if num_classes is None:
        raise ValueError("Pass num_classes statically (avoids a device->host sync "
                         "that would break jit).")

    num_support = int(proto_support_labels.shape[0])
    if num_support < k + 1:
        k = num_support - 1
    kp1 = k + 1

    # ---- tile-invariant work hoisted out of the kernel's grid loop ---------------
    q_pooled = _pool(query_images).astype(jnp.float32)            # [Nq, C]
    s_pooled = _pool(proto_support_images).astype(jnp.float32)    # [Ns, C]
    s_norm = _l2_normalize(s_pooled)                              # [Ns, C]

    wpad = _round_up(num_classes, 128)
    one_hot_pad = jax.nn.one_hot(proto_support_labels, wpad, dtype=jnp.float32)
    proto = jnp.dot(s_norm.T, one_hot_pad)                        # [C, WPAD]
    p_ss = jnp.sum(proto * proto, axis=0, keepdims=True)          # [1, WPAD]
    oh_scaled = one_hot_pad * lax.rsqrt(jnp.maximum(p_ss, 1e-24)) # fold 1/||proto_c||

    s_nt = s_norm.T.astype(matmul_dtype)                          # [C, Ns] MXU-native

    # ---- tile the query axis: >=2 tiles (v7x dual TC), big tiles otherwise -------
    nq, c = q_pooled.shape
    tq = max(8, min(_round_up(block_q, 8), _round_up(pl.cdiv(nq, 2), 8)))
    nq_pad = _round_up(nq, tq)
    q_pad = jnp.pad(q_pooled, ((0, nq_pad - nq), (0, 0)))         # zero rows -> finite math

    pk = _round_up(2 * kp1, 128)
    dk, sc_pad = _fused_call(q_pad, s_nt, oh_scaled, kp1, tq, pk)

    half = pk // 2
    distances = dk[:nq, :kp1]                                     # [Nq, k+1]
    indices = dk[:nq, half:half + kp1].astype(jnp.int32)          # [Nq, k+1]
    scores = sc_pad[:nq, :num_classes]                            # [Nq, way]

    # Self-match filtering for k == 5 (reference: round(d, 6) == 0). A tolerance on
    # |d| is more robust to fp error than rounding; requires f32 sim (default).
    if k == 5:
        self_match = jnp.abs(distances[:, 0]) <= 1e-5
        distances2 = jnp.where(self_match[:, None], distances[:, 1:6], distances[:, 0:5])
        indices2 = jnp.where(self_match[:, None], indices[:, 1:6], indices[:, 0:5])
    else:
        distances2 = distances
        indices2 = indices
    indices2 = indices2.astype(jnp.int32)

    # Majority vote over the first k neighbours (torch.bincount(...).argmax per row;
    # argmax ties -> smallest label, same as bincount().argmax()).
    nb_labels = jnp.take(proto_support_labels, indices2[:, :k], axis=0)        # [Nq, k]
    vote = jnp.sum(jax.nn.one_hot(nb_labels, num_classes, dtype=jnp.int32), axis=1)
    test_predictions = jnp.argmax(vote, axis=1).astype(jnp.int32)

    # TODO(synk): `start_deep(...)` is undefined in the reference; the canonical
    # prototypical-network cosine scores (computed in-kernel) are used instead.
    scale = jnp.asarray(scale_cls, jnp.float32).reshape(())
    classification_scores = scale * scores

    return classification_scores, indices2, distances2, test_predictions, scores


if __name__ == "__main__":
    key = jax.random.PRNGKey(0)
    way, shots, nq, C, H, W, k = 5, 5, 10, 64, 4, 4, 3
    ns = way * shots
    k1, k2 = jax.random.split(key, 2)

    proto_support_images = jax.random.normal(k1, (ns, C, H, W), jnp.float32)  # NCHW
    query_images = jax.random.normal(k2, (nq, C, H, W), jnp.float32)          # NCHW
    proto_support_labels = jnp.tile(jnp.arange(way, dtype=jnp.int32), shots)  # [ns]
    support_images = proto_support_images                                     # unused
    support_labels = jax.nn.one_hot(proto_support_labels, way)                # unused

    # learn_scale=True -> nn.Parameter filled with 10.0 (deterministic init)
    scale_cls = jnp.full((1,), 10.0, jnp.float32)

    fwd = jax.jit(pn_head_forward, static_argnames=("k", "num_classes", "block_q"))
    outs = fwd(scale_cls, proto_support_images, proto_support_labels,
               query_images, support_images, support_labels,
               k=k, num_classes=way, block_q=8)   # block_q=8 -> multi-tile grid path
    outs = jax.block_until_ready(outs)

    cls_scores, indices2, distances2, test_predictions, scores = outs
    assert cls_scores.shape == (nq, way)
    assert indices2.shape == (nq, k + 1)
    assert distances2.shape == (nq, k + 1)
    assert test_predictions.shape == (nq,)
    assert scores.shape == (nq, way)

    # ---- pure-JAX reference check ------------------------------------------------
    qf = jnp.mean(query_images.reshape(nq, C, H * W), axis=2)
    sf = jnp.mean(proto_support_images.reshape(ns, C, H * W), axis=2)
    qn = qf / jnp.maximum(jnp.linalg.norm(qf, axis=1, keepdims=True), 1e-12)
    sn = sf / jnp.maximum(jnp.linalg.norm(sf, axis=1, keepdims=True), 1e-12)
    d_ref = 1.0 - qn @ sn.T
    ref_topk = jnp.sort(d_ref, axis=1)[:, :k + 1]
    assert jnp.allclose(distances2, ref_topk, atol=2e-5), "top-k distances mismatch"
    proto_ref = sn.T @ jax.nn.one_hot(proto_support_labels, way, dtype=jnp.float32)
    proto_ref = proto_ref / jnp.maximum(jnp.linalg.norm(proto_ref, axis=0, keepdims=True), 1e-12)
    ref_scores = qn @ proto_ref
    assert jnp.allclose(scores, ref_scores, atol=2e-5), "proto scores mismatch"
    assert jnp.allclose(cls_scores, 10.0 * ref_scores, atol=2e-4), "scaled scores mismatch"
    # sanity: neighbour distances sorted ascending, indices valid
    assert bool(jnp.all(distances2[:, :-1] <= distances2[:, 1:] + 1e-6))
    assert bool(jnp.all((indices2 >= 0) & (indices2 < ns)))
    print("KERNEL_OK")
</pallas_src>

<mosaic_0001>
module attributes {stable_mosaic.version = 11 : i64} {
  func.func @kernel(%arg0: i32, %arg1: memref<8x64xf32, #tpu.memory_space<vmem>>, %arg2: memref<64x25xf32, #tpu.memory_space<vmem>>, %arg3: memref<25x128xf32, #tpu.memory_space<vmem>>, %arg4: memref<8x128xf32, #tpu.memory_space<vmem>>, %arg5: memref<8x128xf32, #tpu.memory_space<vmem>>) attributes {dimension_semantics = [#tpu.dimension_semantics<parallel>], iteration_bounds = array<i64: 2>, scalar_prefetch = 0 : i64, scratch_operands = 0 : i64, tpu.core_type = #tpu.core_type<tc>, window_params = [{transform_indices = @transform_0, window_bounds = array<i64: 8, 64>}, {pipeline_mode = #tpu.pipeline_mode<synchronous>, transform_indices = @transform_1, window_bounds = array<i64: 64, 25>}, {pipeline_mode = #tpu.pipeline_mode<synchronous>, transform_indices = @transform_2, window_bounds = array<i64: 25, 128>}, {transform_indices = @transform_3, window_bounds = array<i64: 8, 128>}, {transform_indices = @transform_4, window_bounds = array<i64: 8, 128>}]} {
    %c0 = arith.constant 0 : index
    %c0_0 = arith.constant 0 : index
    %0 = vector.load %arg1[%c0, %c0_0] : memref<8x64xf32, #tpu.memory_space<vmem>>, vector<8x64xf32>
    %1 = arith.mulf %0, %0 : vector<8x64xf32>
    %cst = arith.constant dense<0.000000e+00> : vector<8xf32>
    %2 = vector.multi_reduction <add>, %1, %cst [1] : vector<8x64xf32> to vector<8xf32>
    %3 = vector.shape_cast %2 : vector<8xf32> to vector<8x1xf32>
    %cst_1 = arith.constant 1.000000e-24 : f32
    %4 = vector.broadcast %cst_1 : f32 to vector<8x1xf32>
    %5 = arith.maximumf %3, %4 : vector<8x1xf32>
    %6 = math.rsqrt %5 : vector<8x1xf32>
    %7 = vector.broadcast %6 : vector<8x1xf32> to vector<8x64xf32>
    %8 = arith.mulf %0, %7 : vector<8x64xf32>
    %c0_2 = arith.constant 0 : index
    %c0_3 = arith.constant 0 : index
    %9 = vector.load %arg2[%c0_2, %c0_3] : memref<64x25xf32, #tpu.memory_space<vmem>>, vector<64x25xf32>
    %cst_4 = arith.constant dense<0.000000e+00> : vector<8x25xf32>
    %10 = tpu.matmul %8, %9, %cst_4 {dimension_numbers = #tpu.dot_dimension_numbers<[1], [0], [0], [1], [0, 0, 1, 1], [], []>} : vector<8x64xf32>, vector<64x25xf32>, vector<8x25xf32> -> vector<8x25xf32>
    %c0_5 = arith.constant 0 : index
    %c0_6 = arith.constant 0 : index
    %11 = vector.load %arg3[%c0_5, %c0_6] : memref<25x128xf32, #tpu.memory_space<vmem>>, vector<25x128xf32>
    %cst_7 = arith.constant dense<0.000000e+00> : vector<8x128xf32>
    %12 = tpu.matmul %10, %11, %cst_7 {dimension_numbers = #tpu.dot_dimension_numbers<[1], [0], [0], [1], [0, 0, 1, 1], [], []>} : vector<8x25xf32>, vector<25x128xf32>, vector<8x128xf32> -> vector<8x128xf32>
    %c0_8 = arith.constant 0 : index
    %c0_9 = arith.constant 0 : index
    %13 = vector.load %arg5[%c0_8, %c0_9] : memref<8x128xf32, #tpu.memory_space<vmem>>, vector<8x128xf32>
    tpu.vector_store %arg5[%c0_8, %c0_9], %12 {strides = array<i32>} : memref<8x128xf32, #tpu.memory_space<vmem>>, vector<8x128xf32>,
    %cst_10 = arith.constant 1.000000e+00 : f32
    %14 = vector.broadcast %cst_10 : f32 to vector<8x25xf32>
    %15 = arith.subf %14, %10 : vector<8x25xf32>
    %16 = tpu.iota {dimensions = array<i32: 1>} : vector<8x25xi32>
    %17 = tpu.iota {dimensions = array<i32: 1>} : vector<8x128xi32>
    %cst_11 = arith.constant 0.000000e+00 : f32
    %18 = vector.broadcast %cst_11 : f32 to vector<8x128xf32>
    %cst_12 = arith.constant dense<0x7F800000> : vector<8xf32>
    %19 = vector.multi_reduction <minimumf>, %15, %cst_12 [1] : vector<8x25xf32> to vector<8xf32>
    %20 = vector.shape_cast %19 : vector<8xf32> to vector<8x1xf32>
    %21 = vector.broadcast %20 : vector<8x1xf32> to vector<8x25xf32>
    %22 = arith.cmpf oeq, %15, %21 : vector<8x25xf32>
    %c25_i32 = arith.constant 25 : i32
    %23 = vector.broadcast %c25_i32 : i32 to vector<8x25xi32>
    %24 = arith.select %22, %16, %23 : vector<8x25xi1>, vector<8x25xi32>
    %cst_13 = arith.constant dense<2147483647> : vector<8xi32>
    %25 = vector.multi_reduction <minsi>, %24, %cst_13 [1] : vector<8x25xi32> to vector<8xi32>
    %26 = vector.shape_cast %25 : vector<8xi32> to vector<8x1xi32>
    %c0_i32 = arith.constant 0 : i32
    %27 = vector.broadcast %c0_i32 : i32 to vector<8x128xi32>
    %28 = arith.cmpi eq, %17, %27 : vector<8x128xi32>
    %29 = vector.shape_cast %20 : vector<8x1xf32> to vector<8x1xf32>
    %30 = vector.broadcast %29 : vector<8x1xf32> to vector<8x128xf32>
    %31 = arith.select %28, %30, %18 : vector<8x128xi1>, vector<8x128xf32>
    %c64_i32 = arith.constant 64 : i32
    %32 = vector.broadcast %c64_i32 : i32 to vector<8x128xi32>
    %33 = arith.cmpi eq, %17, %32 : vector<8x128xi32>
    %34 = arith.sitofp %26 : vector<8x1xi32> to vector<8x1xf32>
    %35 = vector.shape_cast %34 : vector<8x1xf32> to vector<8x1xf32>
    %36 = vector.broadcast %35 : vector<8x1xf32> to vector<8x128xf32>
    %37 = arith.select %33, %36, %31 : vector<8x128xi1>, vector<8x128xf32>
    %38 = vector.broadcast %26 : vector<8x1xi32> to vector<8x25xi32>
    %39 = arith.cmpi eq, %16, %38 : vector<8x25xi32>
    %cst_14 = arith.constant 0x7F800000 : f32
    %40 = vector.broadcast %cst_14 : f32 to vector<8x25xf32>
    %41 = arith.select %39, %40, %15 : vector<8x25xi1>, vector<8x25xf32>
    %cst_15 = arith.constant dense<0x7F800000> : vector<8xf32>
    %42 = vector.multi_reduction <minimumf>, %41, %cst_15 [1] : vector<8x25xf32> to vector<8xf32>
    %43 = vector.shape_cast %42 : vector<8xf32> to vector<8x1xf32>
    %44 = vector.broadcast %43 : vector<8x1xf32> to vector<8x25xf32>
    %45 = arith.cmpf oeq, %41, %44 : vector<8x25xf32>
    %c25_i32_16 = arith.constant 25 : i32
    %46 = vector.broadcast %c25_i32_16 : i32 to vector<8x25xi32>
    %47 = arith.select %45, %16, %46 : vector<8x25xi1>, vector<8x25xi32>
    %cst_17 = arith.constant dense<2147483647> : vector<8xi32>
    %48 = vector.multi_reduction <minsi>, %47, %cst_17 [1] : vector<8x25xi32> to vector<8xi32>
    %49 = vector.shape_cast %48 : vector<8xi32> to vector<8x1xi32>
    %c1_i32 = arith.constant 1 : i32
    %50 = vector.broadcast %c1_i32 : i32 to vector<8x128xi32>
    %51 = arith.cmpi eq, %17, %50 : vector<8x128xi32>
    %52 = vector.shape_cast %43 : vector<8x1xf32> to vector<8x1xf32>
    %53 = vector.broadcast %52 : vector<8x1xf32> to vector<8x128xf32>
    %54 = arith.select %51, %53, %37 : vector<8x128xi1>, vector<8x128xf32>
    %c65_i32 = arith.constant 65 : i32
    %55 = vector.broadcast %c65_i32 : i32 to vector<8x128xi32>
    %56 = arith.cmpi eq, %17, %55 : vector<8x128xi32>
    %57 = arith.sitofp %49 : vector<8x1xi32> to vector<8x1xf32>
    %58 = vector.shape_cast %57 : vector<8x1xf32> to vector<8x1xf32>
    %59 = vector.broadcast %58 : vector<8x1xf32> to vector<8x128xf32>
    %60 = arith.select %56, %59, %54 : vector<8x128xi1>, vector<8x128xf32>
    %61 = vector.broadcast %49 : vector<8x1xi32> to vector<8x25xi32>
    %62 = arith.cmpi eq, %16, %61 : vector<8x25xi32>
    %cst_18 = arith.constant 0x7F800000 : f32
    %63 = vector.broadcast %cst_18 : f32 to vector<8x25xf32>
    %64 = arith.select %62, %63, %41 : vector<8x25xi1>, vector<8x25xf32>
    %cst_19 = arith.constant dense<0x7F800000> : vector<8xf32>
    %65 = vector.multi_reduction <minimumf>, %64, %cst_19 [1] : vector<8x25xf32> to vector<8xf32>
    %66 = vector.shape_cast %65 : vector<8xf32> to vector<8x1xf32>
    %67 = vector.broadcast %66 : vector<8x1xf32> to vector<8x25xf32>
    %68 = arith.cmpf oeq, %64, %67 : vector<8x25xf32>
    %c25_i32_20 = arith.constant 25 : i32
    %69 = vector.broadcast %c25_i32_20 : i32 to vector<8x25xi32>
    %70 = arith.select %68, %16, %69 : vector<8x25xi1>, vector<8x25xi32>
    %cst_21 = arith.constant dense<2147483647> : vector<8xi32>
    %71 = vector.multi_reduction <minsi>, %70, %cst_21 [1] : vector<8x25xi32> to vector<8xi32>
    %72 = vector.shape_cast %71 : vector<8xi32> to vector<8x1xi32>
    %c2_i32 = arith.constant 2 : i32
    %73 = vector.broadcast %c2_i32 : i32 to vector<8x128xi32>
    %74 = arith.cmpi eq, %17, %73 : vector<8x128xi32>
    %75 = vector.shape_cast %66 : vector<8x1xf32> to vector<8x1xf32>
    %76 = vector.broadcast %75 : vector<8x1xf32> to vector<8x128xf32>
    %77 = arith.select %74, %76, %60 : vector<8x128xi1>, vector<8x128xf32>
    %c66_i32 = arith.constant 66 : i32
    %78 = vector.broadcast %c66_i32 : i32 to vector<8x128xi32>
    %79 = arith.cmpi eq, %17, %78 : vector<8x128xi32>
    %80 = arith.sitofp %72 : vector<8x1xi32> to vector<8x1xf32>
    %81 = vector.shape_cast %80 : vector<8x1xf32> to vector<8x1xf32>
    %82 = vector.broadcast %81 : vector<8x1xf32> to vector<8x128xf32>
    %83 = arith.select %79, %82, %77 : vector<8x128xi1>, vector<8x128xf32>
    %84 = vector.broadcast %72 : vector<8x1xi32> to vector<8x25xi32>
    %85 = arith.cmpi eq, %16, %84 : vector<8x25xi32>
    %cst_22 = arith.constant 0x7F800000 : f32
    %86 = vector.broadcast %cst_22 : f32 to vector<8x25xf32>
    %87 = arith.select %85, %86, %64 : vector<8x25xi1>, vector<8x25xf32>
    %cst_23 = arith.constant dense<0x7F800000> : vector<8xf32>
    %88 = vector.multi_reduction <minimumf>, %87, %cst_23 [1] : vector<8x25xf32> to vector<8xf32>
    %89 = vector.shape_cast %88 : vector<8xf32> to vector<8x1xf32>
    %90 = vector.broadcast %89 : vector<8x1xf32> to vector<8x25xf32>
    %91 = arith.cmpf oeq, %87, %90 : vector<8x25xf32>
    %c25_i32_24 = arith.constant 25 : i32
    %92 = vector.broadcast %c25_i32_24 : i32 to vector<8x25xi32>
    %93 = arith.select %91, %16, %92 : vector<8x25xi1>, vector<8x25xi32>
    %cst_25 = arith.constant dense<2147483647> : vector<8xi32>
    %94 = vector.multi_reduction <minsi>, %93, %cst_25 [1] : vector<8x25xi32> to vector<8xi32>
    %95 = vector.shape_cast %94 : vector<8xi32> to vector<8x1xi32>
    %c3_i32 = arith.constant 3 : i32
    %96 = vector.broadcast %c3_i32 : i32 to vector<8x128xi32>
    %97 = arith.cmpi eq, %17, %96 : vector<8x128xi32>
    %98 = vector.shape_cast %89 : vector<8x1xf32> to vector<8x1xf32>
    %99 = vector.broadcast %98 : vector<8x1xf32> to vector<8x128xf32>
    %100 = arith.select %97, %99, %83 : vector<8x128xi1>, vector<8x128xf32>
    %c67_i32 = arith.constant 67 : i32
    %101 = vector.broadcast %c67_i32 : i32 to vector<8x128xi32>
    %102 = arith.cmpi eq, %17, %101 : vector<8x128xi32>
    %103 = arith.sitofp %95 : vector<8x1xi32> to vector<8x1xf32>
    %104 = vector.shape_cast %103 : vector<8x1xf32> to vector<8x1xf32>
    %105 = vector.broadcast %104 : vector<8x1xf32> to vector<8x128xf32>
    %106 = arith.select %102, %105, %100 : vector<8x128xi1>, vector<8x128xf32>
    %c0_26 = arith.constant 0 : index
    %c0_27 = arith.constant 0 : index
    %107 = vector.load %arg4[%c0_26, %c0_27] : memref<8x128xf32, #tpu.memory_space<vmem>>, vector<8x128xf32>
    tpu.vector_store %arg4[%c0_26, %c0_27], %106 {strides = array<i32>} : memref<8x128xf32, #tpu.memory_space<vmem>>, vector<8x128xf32>,
    return
  }
  func.func @transform_0(%arg0: i32) -> (i32, i32) {
    %c0_i32 = arith.constant 0 : i32
    %c0_i32_0 = arith.constant 0 : i32
    return %arg0, %c0_i32 : i32, i32
  }
  func.func @transform_1(%arg0: i32) -> (i32, i32) {
    %c0_i32 = arith.constant 0 : i32
    %c0_i32_0 = arith.constant 0 : i32
    %c0_i32_1 = arith.constant 0 : i32
    return %c0_i32, %c0_i32_0 : i32, i32
  }
  func.func @transform_2(%arg0: i32) -> (i32, i32) {
    %c0_i32 = arith.constant 0 : i32
    %c0_i32_0 = arith.constant 0 : i32
    %c0_i32_1 = arith.constant 0 : i32
    return %c0_i32, %c0_i32_0 : i32, i32
  }
  func.func @transform_3(%arg0: i32) -> (i32, i32) {
    %c0_i32 = arith.constant 0 : i32
    %c0_i32_0 = arith.constant 0 : i32
    return %arg0, %c0_i32 : i32, i32
  }
  func.func @transform_4(%arg0: i32) -> (i32, i32) {
    %c0_i32 = arith.constant 0 : i32
    %c0_i32_0 = arith.constant 0 : i32
    return %arg0, %c0_i32 : i32, i32
  }
}

</mosaic_0001>

<bundles_post_ra>
// kernel: pn_head_forward.1
= control target key start
LH: loop header
LB: loop body
LE: loop exit
PB: predicated region body
PF: predicated region fallthrough
CT: control target
= control target key end

     0   :  { %s536_s15 = smov 0   ;;  %s625_s0 = inlined_call_operand.vmem [shape: f32[16,64], index: 0, kind: input, shape index: {}]   ;;  %s626_s1 = inlined_call_operand.vmem [shape: f32[64,25], index: 1, kind: input, shape index: {}]   ;;  %s627_s2 = inlined_call_operand.vmem [shape: f32[25,128], index: 2, kind: input, shape index: {}]   ;;  %s628_s3 = inlined_call_operand.vmem [shape: f32[16,128], index: 3, kind: output, shape index: {0}]   ;;  %s629_s4 = inlined_call_operand.vmem [shape: f32[16,128], index: 4, kind: output, shape index: {1}]  }
   0x1 LB: > { %s480_s16 = sadd.s32 4294967295, %s509_s15   ;;  %p484_p0 = scmp.ge.s32.totalorder %s509_s15, 1  ;;  %s509_s15 = sphi %s536_s15, %s15_s15  }
   0x2   : > { %p164_p1 = scmp.lt.s32.totalorder %s509_s15, 3 }
   0x4   : > { %p165_p2 = pnand %p484_p0, %p164_p1 }
   0x5   : > { %p192_p3 = scmp.lt.s32.totalorder (!%p165_p2), %s480_s16, 1 }
   0x6   : > { %168 = sbr.rel (%p165_p2) target bundleno = 1742 (0x6ce), region = 32 }
   0xb   : > { %s631_s16 = smov (!%p192_p3, %s480_s16), 1  ;;  %vm206_vm0 = vcmask 523264   ;;  %v229_v3 = vld [vmem:[%s626_s1 + $0x38] sm:$0xff]  ;;  %v228_v4 = vld [vmem:[%s626_s1 + $0x30] sm:$0xff]  ;;  %v227_v5 = vld [vmem:[%s626_s1 + $0x28] sm:$0xff]  ;;  %vm261_vm1 = vcmask 1040384   ;;  %v287_v28 = vlaneseq }
   0xc   : > { %s544_s17 = sshll.u32 %s631_s16, 3  ;;  %241 = vmatpush.msra.mxu0 %v229_v3  ;;  %v226_v6 = vld [vmem:[%s626_s1 + $0x20] sm:$0xff]  ;;  %v225_v7 = vld [vmem:[%s626_s1 + $0x18] sm:$0xff]  ;;  %v224_v8 = vld [vmem:[%s626_s1 + $0x10] sm:$0xff]  ;;  %vm257_vm5 = vcmask 203776  }
   0xd   : > { %s195_s20 = scalar_lea.vmem %s625_s0, %s544_s17  ;;  %v223_v9 = vld [vmem:[%s626_s1 + $0x8] sm:$0xff]  ;;  %v222_v10 = vld [vmem:[%s626_s1] sm:$0xff]  ;;  %v256_v11 = vld [vmem:[%s627_s2 + $0x18] sm:$0x1]  ;;  %v590_v29 = vand.u32 127, %v287_v28  ;;  %s203_s23 = scalar_lea.vmem %s629_s4, %s544_s17 }
   0xe   : > { %v204_v0 = vld [vmem:[%s195_s20] sm:$0xff]  ;;  %242 = vmatpush.msra.mxu0 %v228_v4  ;;  %v255_v12 = vld [vmem:[%s627_s2 + $0x10] sm:$0xff]  ;;  %489 = vmatpush.msk.msra.mxu1 %vm261_vm1, %v256_v11  ;;  %v254_v13 = vld [vmem:[%s627_s2 + $0x8] sm:$0xff]  ;;  %s199_s26 = scalar_lea.vmem %s628_s3, %s544_s17 }
   0xf   : > { %v205_v1 = vmul.f32 %v204_v0, %v204_v0  ;;  %v253_v24 = vld [vmem:[%s627_s2] sm:$0xff]  ;;  %vm309_vm11 = vcmp.eq.s32.totalorder %v590_v29, 0  ;;  %vm311_vm12 = vcmp.eq.s32.totalorder %v590_v29, 64  ;;  %vm336_vm13 = vcmp.eq.s32.totalorder %v590_v29, 1 }
  0x10   : > { %243 = vmatpush.msra.mxu0 %v227_v5  ;;  %278 = vmatpush.msra.mxu1 %v255_v12  ;;  %vm338_vm14 = vcmp.eq.s32.totalorder %v590_v29, 65 }
  0x11   : > { %v207_v2 = vsel %vm206_vm0, %v205_v1, 0.0 }
  0x12   : > { %208 = vadd.xlane.f32.xlu0 %v207_v2  ;;  %244 = vmatpush.msra.mxu0 %v226_v6 }
  0x13   : > { %279 = vmatpush.msra.mxu1 %v254_v13 }
  0x14   : > { %245 = vmatpush.msra.mxu0 %v225_v7 }
  0x15   : > { %280 = vmatpush.msra.mxu1 %v253_v24 }
  0x16   : > { %246 = vmatpush.msra.mxu0 %v224_v8 }
  0x18   : > { %247 = vmatpush.msra.mxu0 %v223_v9 }
  0x1a   : > { %248 = vmatpush.msra.mxu0 %v222_v10 }
  0x85   : > { %v209_v14 = vpop.xlane.xlu0 %208 }
  0x86   : > { %v210_v15 = vmax.f32 %v209_v14, 1e-24 }
  0x88   : > { %501 = vrsqrt.f32 %v210_v15  ;;  %vm217_vm3 = vweird.f32 %v210_v15 }
  0x8e   : > { %v502_v16 = vpop.eup %501 }
  0x8f   : > { %v212_v17 = vmul.f32 %v502_v16, %v210_v15  ;;  %vm218_vm2 = vweird.f32 %v502_v16 }
  0x90   : > { %vm219_vm4 = vmor %vm217_vm3, %vm218_vm2  ;;  %vm363_vm2 = vcmp.eq.s32.totalorder %v590_v29, 2  ;;  %vm365_vm3 = vcmp.eq.s32.totalorder %v590_v29, 66 }
  0x91   : > { %v213_v18 = vmul.f32 %v502_v16, %v212_v17 }
  0x93   : > { %v214_v19 = vmul.f32 0.5, %v213_v18 }
  0x95   : > { %v215_v20 = vsub.f32 1.5, %v214_v19 }
  0x97   : > { %v216_v21 = vmul.f32 %v502_v16, %v215_v20 }
  0x99   : > { %v220_v22 = vsel %vm219_vm4, %v502_v16, %v216_v21 }
  0x9a   : > { %v221_v23 = vmul.f32 %v220_v22, %v204_v0 }
  0x9c   : > { %488 = vmatmul.msk.f32.vlgmr.msra.gmra.mxu0 %vm206_vm0, %v221_v23 }
 0x119   : > { %v250_v25 = vpop.f32.mrf.mxu0 }
 0x11a   : > { %v286_v26 = vsub.f32 1.0, %v250_v25  ;;  %490 = vmatmul.msk.f32.vlgmr.msra.gmra.mxu1 %vm257_vm5, %v250_v25 }
 0x11c   : > { %v289_v27 = vsel %vm257_vm5, %v286_v26, inf }
 0x11d   : > { %290 = vmin.xlane.f32.xlu0 %v289_v27 }
 0x190   : > { %v291_v30 = vpop.xlane.xlu0 %290 }
 0x191   : > { %vm292_vm6 = vcmp.eq.f32.partialorder %v286_v26, %v291_v30  ;;  %v310_v62 = vsel %vm309_vm11, %v291_v30, 0.0 }
 0x192   : > { %v293_v31 = vsel %vm292_vm6, %v590_v29, 25  ;;  %vm390_vm6 = vcmp.eq.s32.totalorder %v590_v29, 3 }
 0x193   : > { %v294_v32 = vsel %vm257_vm5, %v293_v31, 2147483647 }
 0x194   : > { %v296_v33 = vshra.s32 %v294_v32, 16  ;;  %v295_v36 = vand.u32 65535, %v294_v32 }
 0x196   : > { %v298_v34 = vcvt.s32.f32 %v296_v33  ;;  %v297_v38 = vcvt.s32.f32 %v295_v36 }
 0x197   : > { %v282_v35 = vpop.f32.mrf.mxu1 }
 0x198   : > { %285 = vst [vmem:[%s203_s23] sm:$0xff] %v282_v35  ;;  %299 = vmin.xlane.f32.xlu1 %v298_v34 }
 0x20b   : > { %v300_v37 = vpop.xlane.xlu1 %299 }
 0x20c   : > { %vm301_vm7 = vcmp.eq.f32.partialorder %v298_v34, %v300_v37  ;;  %v306_v40 = vcvt.f32.s32 %v300_v37 }
 0x20d   : > { %v302_v39 = vsel %vm301_vm7, %v297_v38, inf }
 0x20e   : > { %303 = vmin.xlane.f32.xlu1 %v302_v39  ;;  %v307_v42 = vshll.u32 %v306_v40, 16 }
 0x281   : > { %v304_v41 = vpop.xlane.xlu1 %303 }
 0x282   : > { %v305_v43 = vcvt.f32.s32 %v304_v41 }
 0x284   : > { %v308_v44 = vadd.s32 %v307_v42, %v305_v43 }
 0x286   : > { %vm314_vm8 = vcmp.eq.s32.totalorder %v590_v29, %v308_v44  ;;  %v312_v58 = vcvt.s32.f32 %v308_v44 }
 0x287   : > { %v315_v45 = vsel %vm314_vm8, inf, %v286_v26 }
 0x288   : > { %v316_v46 = vsel %vm257_vm5, %v315_v45, inf  ;;  %v313_v63 = vsel %vm311_vm12, %v312_v58, %v310_v62 }
 0x289   : > { %317 = vmin.xlane.f32.xlu2 %v316_v46 }
 0x2fc   : > { %v318_v47 = vpop.xlane.xlu2 %317 }
 0x2fd   : > { %vm319_vm9 = vcmp.eq.f32.partialorder %v315_v45, %v318_v47  ;;  %v337_v1 = vsel %vm336_vm13, %v318_v47, %v313_v63 }
 0x2fe   : > { %v320_v48 = vsel %vm319_vm9, %v590_v29, 25  ;;  %vm392_vm9 = vcmp.eq.s32.totalorder %v590_v29, 67 }
 0x2ff   : > { %v321_v49 = vsel %vm257_vm5, %v320_v48, 2147483647 }
 0x300   : > { %v323_v50 = vshra.s32 %v321_v49, 16  ;;  %v322_v52 = vand.u32 65535, %v321_v49 }
 0x302   : > { %v325_v51 = vcvt.s32.f32 %v323_v50  ;;  %v324_v54 = vcvt.s32.f32 %v322_v52 }
 0x304   : > { %326 = vmin.xlane.f32.xlu2 %v325_v51 }
 0x377   : > { %v327_v53 = vpop.xlane.xlu2 %326 }
 0x378   : > { %vm328_vm10 = vcmp.eq.f32.partialorder %v325_v51, %v327_v53  ;;  %v333_v56 = vcvt.f32.s32 %v327_v53 }
 0x379   : > { %v329_v55 = vsel %vm328_vm10, %v324_v54, inf }
 0x37a   : > { %330 = vmin.xlane.f32.xlu0 %v329_v55  ;;  %v334_v59 = vshll.u32 %v333_v56, 16 }
 0x3ed   : > { %v331_v57 = vpop.xlane.xlu0 %330 }
 0x3ee   : > { %v332_v60 = vcvt.f32.s32 %v331_v57 }
 0x3f0   : > { %v335_v61 = vadd.s32 %v334_v59, %v332_v60 }
 0x3f2   : > { %v339_v0 = vcvt.s32.f32 %v335_v61  ;;  %vm341_vm15 = vcmp.eq.s32.totalorder %v590_v29, %v335_v61 }
 0x3f3   : > { %v342_v2 = vsel %vm341_vm15, inf, %v315_v45 }
 0x3f4   : > { %v343_v3 = vsel %vm257_vm5, %v342_v2, inf  ;;  %v340_v4 = vsel %vm338_vm14, %v339_v0, %v337_v1 }
 0x3f5   : > { %344 = vmin.xlane.f32.xlu1 %v343_v3 }
 0x468   : > { %v345_v5 = vpop.xlane.xlu1 %344 }
 0x469   : > { %vm346_vm0 = vcmp.eq.f32.partialorder %v342_v2, %v345_v5  ;;  %v364_v20 = vsel %vm363_vm2, %v345_v5, %v340_v4 }
 0x46a   : > { %v347_v6 = vsel %vm346_vm0, %v590_v29, 25 }
 0x46b   : > { %v348_v7 = vsel %vm257_vm5, %v347_v6, 2147483647 }
 0x46c   : > { %v350_v8 = vshra.s32 %v348_v7, 16  ;;  %v349_v10 = vand.u32 65535, %v348_v7 }
 0x46e   : > { %v352_v9 = vcvt.s32.f32 %v350_v8  ;;  %v351_v12 = vcvt.s32.f32 %v349_v10 }
 0x470   : > { %353 = vmin.xlane.f32.xlu2 %v352_v9 }
 0x4e3   : > { %v354_v11 = vpop.xlane.xlu2 %353 }
 0x4e4   : > { %vm355_vm1 = vcmp.eq.f32.partialorder %v352_v9, %v354_v11  ;;  %v360_v14 = vcvt.f32.s32 %v354_v11 }
 0x4e5   : > { %v356_v13 = vsel %vm355_vm1, %v351_v12, inf }
 0x4e6   : > { %357 = vmin.xlane.f32.xlu0 %v356_v13  ;;  %v361_v16 = vshll.u32 %v360_v14, 16 }
 0x559   : > { %v358_v15 = vpop.xlane.xlu0 %357 }
 0x55a   : > { %v359_v17 = vcvt.f32.s32 %v358_v15 }
 0x55c   : > { %v362_v18 = vadd.s32 %v361_v16, %v359_v17 }
 0x55e   : > { %v366_v19 = vcvt.s32.f32 %v362_v18  ;;  %vm368_vm4 = vcmp.eq.s32.totalorder %v590_v29, %v362_v18 }
 0x55f   : > { %v369_v21 = vsel %vm368_vm4, inf, %v342_v2 }
 0x560   : > { %v370_v22 = vsel %vm257_vm5, %v369_v21, inf  ;;  %v367_v23 = vsel %vm365_vm3, %v366_v19, %v364_v20 }
 0x561   : > { %371 = vmin.xlane.f32.xlu1 %v370_v22 }
 0x5d4   : > { %v372_v24 = vpop.xlane.xlu1 %371 }
 0x5d5   : > { %vm373_vm7 = vcmp.eq.f32.partialorder %v369_v21, %v372_v24  ;;  %v391_v25 = vsel %vm390_vm6, %v372_v24, %v367_v23 }
 0x5d6   : > { %v374_v26 = vsel %vm373_vm7, %v590_v29, 25 }
 0x5d7   : > { %v375_v27 = vsel %vm257_vm5, %v374_v26, 2147483647 }
 0x5d8   : > { %v377_v28 = vshra.s32 %v375_v27, 16  ;;  %v376_v31 = vand.u32 65535, %v375_v27 }
 0x5da   : > { %v379_v30 = vcvt.s32.f32 %v377_v28  ;;  %v378_v33 = vcvt.s32.f32 %v376_v31 }
 0x5dc   : > { %380 = vmin.xlane.f32.xlu2 %v379_v30 }
 0x64f   : > { %v381_v32 = vpop.xlane.xlu2 %380 }
 0x650   : > { %vm382_vm8 = vcmp.eq.f32.partialorder %v379_v30, %v381_v32  ;;  %v387_v35 = vcvt.f32.s32 %v381_v32 }
 0x651   : > { %v383_v34 = vsel %vm382_vm8, %v378_v33, inf }
 0x652   : > { %384 = vmin.xlane.f32.xlu0 %v383_v34  ;;  %v388_v37 = vshll.u32 %v387_v35, 16 }
 0x6c5   : > { %v385_v36 = vpop.xlane.xlu0 %384 }
 0x6c6   : > { %v386_v38 = vcvt.f32.s32 %v385_v36 }
 0x6c8   : > { %v389_v39 = vadd.s32 %v388_v37, %v386_v38 }
 0x6ca   : > { %v393_v40 = vcvt.s32.f32 %v389_v39 }
 0x6cc   : > { %v394_v41 = vsel %vm392_vm9, %v393_v40, %v391_v25 }
 0x6cd   : > { %395 = vst [vmem:[%s199_s26] sm:$0xff] %v394_v41 }
 0x6ce PF: > { %s15_s15 = sadd.s32 1, %s509_s15  }
 0x6cf   : > { %p12_p4 = scmp.ge.s32.totalorder %s15_s15, 4  }
 0x6d1   :  { %14 = sbr.rel (!%p12_p4) target bundleno = 1 (0x1), region = 74 }

</bundles_post_ra>
